<compile_context>
chip_gen: v7x
topology: tpu7x:2x2x1
jax: 0.10.0
libtpu: 0.0.40
codegen_flags: <defaults>
</compile_context>

<pallas_src>
import functools

import jax
import jax.numpy as jnp
from jax.experimental import pallas as pl
from jax.experimental.pallas import tpu as pltpu


def _round_up(n, m):
    return ((n + m - 1) // m) * m


def _mlp_kernel(x_ref, w1_ref, b1_ref, w2_ref, b2_ref, o_ref, *, reduce_out):
    # fc1 + ReLU: MXU matmul, f32 accumulation (works for f32 or bf16 inputs).
    h = jnp.dot(x_ref[...], w1_ref[...], preferred_element_type=jnp.float32)
    h = jnp.maximum(h + b1_ref[...], 0.0)          # (TB, hidden) + (1, hidden)
    if reduce_out:
        # out_dim == 1: a (TB,hidden)x(hidden,1) matmul would use 1/256 of the
        # MXU columns; VPU multiply + XLU lane reduction is effectively free.
        z = jnp.sum(h * w2_ref[...], axis=-1, keepdims=True)   # w2_ref: (1, hidden)
    else:
        z = jnp.dot(h, w2_ref[...], preferred_element_type=jnp.float32)
    z = z + b2_ref[...]                            # (TB, out) + (1, out)
    o_ref[...] = jax.nn.sigmoid(z).astype(o_ref.dtype)


def attacker_model_forward(x, w1, b1, w2, b2, *,
                           target_tile_bytes=2 << 20,
                           vmem_budget_bytes=40 << 20):
    """x: (B, in_dim); w1: (in_dim, hidden); b1: (hidden,);
       w2: (hidden, out_dim); b2: (out_dim,).  Returns (B, out_dim) float32."""
    B, in_dim = x.shape
    in_dim_w, hidden = w1.shape
    out_dim = w2.shape[1]
    if in_dim_w != in_dim:
        raise ValueError("w1 must be (in_dim, hidden)")

    reduce_out = (out_dim == 1)
    b1_2d = b1.reshape(1, hidden).astype(jnp.float32)
    b2_2d = b2.reshape(1, out_dim).astype(jnp.float32)
    # For the reduction path, present w2 as a (1, hidden) row (VPU broadcast).
    w2_k = w2.reshape(1, hidden) if reduce_out else w2

    x_row_bytes = in_dim * x.dtype.itemsize
    out_row_bytes = out_dim * 4
    weight_bytes = (w1.size * w1.dtype.itemsize + w2_k.size * w2_k.dtype.itemsize
                    + b1_2d.size * 4 + b2_2d.size * 4)

    # ---- Byte-targeted batch tile ------------------------------------------
    tb = _round_up(max(1, -(-target_tile_bytes // x_row_bytes)), 8)
    # Cap tb so the per-call VMEM footprint fits the budget.
    per_row_vmem = 2 * x_row_bytes + 2 * out_row_bytes + hidden * 4
    tb_cap = max(8, (vmem_budget_bytes - weight_bytes - (1 << 20)) // per_row_vmem)
    tb = max(8, min(tb, (tb_cap // 8) * 8))
    tb = min(tb, _round_up(B, 8))

    num_tiles = -(-B // tb)
    x_bytes = B * x_row_bytes
    # v7x has 2 TensorCores: don't strand one on non-trivial single-tile work.
    if num_tiles == 1 and x_bytes > (1 << 20) and B > 8:
        tb = _round_up(-(-B // 2), 8)
        num_tiles = -(-B // tb)

    out_shape = jax.ShapeDtypeStruct((B, out_dim), jnp.float32)
    cost = pl.CostEstimate(
        flops=2 * B * (in_dim * hidden + hidden * out_dim),
        transcendentals=B * out_dim,
        bytes_accessed=x_bytes + weight_bytes + B * out_row_bytes,
    )
    kernel = functools.partial(_mlp_kernel, reduce_out=reduce_out)

    # ---- Single-block fast path (gated on bytes, not rows) ------------------
    whole_vmem = x_bytes + weight_bytes + B * hidden * 4 + B * out_row_bytes
    if num_tiles == 1 and whole_vmem <= (4 << 20):
        return pl.pallas_call(
            kernel,
            out_shape=out_shape,
            cost_estimate=cost,
            compiler_params=pltpu.CompilerParams(
                vmem_limit_bytes=int(min(48 << 20,
                                         max(16 << 20, 2 * whole_vmem)))),
        )(x, w1, b1_2d, w2_k, b2_2d)

    # ---- Tiled, auto-pipelined path ------------------------------------------
    per_call_vmem = (2 * tb * x_row_bytes + 2 * tb * out_row_bytes
                     + tb * hidden * 4 + weight_bytes)
    vmem_limit = int(min(48 << 20, max(16 << 20, per_call_vmem + (4 << 20))))

    def const_spec(shape):
        # Fetched once, single-buffered: constant index_map + Buffered(1).
        return pl.BlockSpec(shape, lambda i: (0, 0),
                            pipeline_mode=pl.Buffered(1))

    return pl.pallas_call(
        kernel,
        out_shape=out_shape,
        grid=(num_tiles,),
        in_specs=[
            # x: blocked along batch -> double-buffered DMA overlapped w/ compute.
            pl.BlockSpec((tb, in_dim), lambda i: (i, 0)),
            const_spec(w1.shape),
            const_spec(b1_2d.shape),
            const_spec(w2_k.shape),
            const_spec(b2_2d.shape),
        ],
        out_specs=pl.BlockSpec((tb, out_dim), lambda i: (i, 0)),
        compiler_params=pltpu.CompilerParams(
            dimension_semantics=("parallel",),
            vmem_limit_bytes=vmem_limit),
        cost_estimate=cost,
    )(x, w1, b1_2d, w2_k, b2_2d)


def init_params(key, input_dim, hidden_dim, output_dim=1):
    # PyTorch nn.Linear default init: U(-1/sqrt(fan_in), 1/sqrt(fan_in)).
    k1, k2, k3, k4 = jax.random.split(key, 4)
    bound1 = 1.0 / jnp.sqrt(input_dim)
    bound2 = 1.0 / jnp.sqrt(hidden_dim)
    w1 = jax.random.uniform(k1, (input_dim, hidden_dim), jnp.float32,
                            -bound1, bound1)
    b1 = jax.random.uniform(k2, (hidden_dim,), jnp.float32, -bound1, bound1)
    w2 = jax.random.uniform(k3, (hidden_dim, output_dim), jnp.float32,
                            -bound2, bound2)
    b2 = jax.random.uniform(k4, (output_dim,), jnp.float32, -bound2, bound2)
    return w1, b1, w2, b2


def _reference(x, w1, b1, w2, b2):
    return jax.nn.sigmoid(jnp.maximum(x @ w1 + b1, 0.0) @ w2 + b2)


if __name__ == "__main__":
    input_dim, hidden_dim, output_dim = 32, 32, 1
    key = jax.random.PRNGKey(0)
    kx, kp, kx2 = jax.random.split(key, 3)
    w1, b1, w2, b2 = init_params(kp, input_dim, hidden_dim, output_dim)

    # 1) Tiny batch -> single-block (no-grid) fast path.
    batch = 8
    x = jax.random.normal(kx, (batch, input_dim), jnp.float32)
    out = jax.block_until_ready(attacker_model_forward(x, w1, b1, w2, b2))
    ref = _reference(x, w1, b1, w2, b2)
    assert out.shape == (batch, output_dim)
    assert jnp.allclose(out, ref, atol=1e-5, rtol=1e-5)

    # 2) Larger, non-tile-multiple batch -> tiled pipelined path with resident
    #    single-buffered weights and a ragged last tile (no jnp.pad copy).
    batch2 = 80
    x2 = jax.random.normal(kx2, (batch2, input_dim), jnp.float32)
    out2 = jax.block_until_ready(
        attacker_model_forward(x2, w1, b1, w2, b2, target_tile_bytes=4096))
    ref2 = _reference(x2, w1, b1, w2, b2)
    assert out2.shape == (batch2, output_dim)
    assert jnp.allclose(out2, ref2, atol=1e-5, rtol=1e-5)

    # 3) bf16 storage for x / w1 / w2 (memory-bound ~2x traffic win on v6e/v7x);
    #    f32 accumulation and f32 biases are kept, kernel body unchanged.
    out3 = jax.block_until_ready(
        attacker_model_forward(x2.astype(jnp.bfloat16),
                               w1.astype(jnp.bfloat16), b1,
                               w2.astype(jnp.bfloat16), b2,
                               target_tile_bytes=4096))
    assert out3.shape == (batch2, output_dim)
    assert float(jnp.max(jnp.abs(out3 - ref2))) < 5e-2

    print("KERNEL_OK")
</pallas_src>

<mosaic_0001>
module attributes {stable_mosaic.version = 11 : i64} {
  func.func @_mlp_kernel(%arg0: memref<8x32xf32, #tpu.memory_space<vmem>>, %arg1: memref<32x32xf32, #tpu.memory_space<vmem>>, %arg2: memref<1x32xf32, #tpu.memory_space<vmem>>, %arg3: memref<1x32xf32, #tpu.memory_space<vmem>>, %arg4: memref<1x1xf32, #tpu.memory_space<vmem>>, %arg5: memref<8x1xf32, #tpu.memory_space<vmem>>) attributes {dimension_semantics = [], scalar_prefetch = 0 : i64, scratch_operands = 0 : i64, tpu.core_type = #tpu.core_type<tc>} {
    %c0 = arith.constant 0 : index
    %c0_0 = arith.constant 0 : index
    %0 = vector.load %arg0[%c0, %c0_0] : memref<8x32xf32, #tpu.memory_space<vmem>>, vector<8x32xf32>
    %c0_1 = arith.constant 0 : index
    %c0_2 = arith.constant 0 : index
    %1 = vector.load %arg1[%c0_1, %c0_2] : memref<32x32xf32, #tpu.memory_space<vmem>>, vector<32x32xf32>
    %cst = arith.constant dense<0.000000e+00> : vector<8x32xf32>
    %2 = tpu.matmul %0, %1, %cst {dimension_numbers = #tpu.dot_dimension_numbers<[1], [0], [0], [1], [0, 0, 1, 1], [], []>} : vector<8x32xf32>, vector<32x32xf32>, vector<8x32xf32> -> vector<8x32xf32>
    %c0_3 = arith.constant 0 : index
    %c0_4 = arith.constant 0 : index
    %3 = vector.load %arg2[%c0_3, %c0_4] : memref<1x32xf32, #tpu.memory_space<vmem>>, vector<1x32xf32>
    %4 = vector.broadcast %3 : vector<1x32xf32> to vector<8x32xf32>
    %5 = arith.addf %2, %4 : vector<8x32xf32>
    %cst_5 = arith.constant 0.000000e+00 : f32
    %6 = vector.broadcast %cst_5 : f32 to vector<8x32xf32>
    %7 = arith.maximumf %5, %6 : vector<8x32xf32>
    %c0_6 = arith.constant 0 : index
    %c0_7 = arith.constant 0 : index
    %8 = vector.load %arg3[%c0_6, %c0_7] : memref<1x32xf32, #tpu.memory_space<vmem>>, vector<1x32xf32>
    %9 = vector.broadcast %8 : vector<1x32xf32> to vector<8x32xf32>
    %10 = arith.mulf %7, %9 : vector<8x32xf32>
    %cst_8 = arith.constant dense<0.000000e+00> : vector<8xf32>
    %11 = vector.multi_reduction <add>, %10, %cst_8 [1] : vector<8x32xf32> to vector<8xf32>
    %12 = vector.shape_cast %11 : vector<8xf32> to vector<8x1xf32>
    %c0_9 = arith.constant 0 : index
    %c0_10 = arith.constant 0 : index
    %13 = vector.load %arg4[%c0_9, %c0_10] : memref<1x1xf32, #tpu.memory_space<vmem>>, vector<1x1xf32>
    %14 = vector.broadcast %13 : vector<1x1xf32> to vector<8x1xf32>
    %15 = arith.addf %12, %14 : vector<8x1xf32>
    %16 = arith.negf %15 : vector<8x1xf32>
    %17 = math.exp %16 : vector<8x1xf32>
    %cst_11 = arith.constant 1.000000e+00 : f32
    %18 = vector.broadcast %cst_11 : f32 to vector<8x1xf32>
    %19 = arith.addf %18, %17 : vector<8x1xf32>
    %20 = arith.divf %18, %19 : vector<8x1xf32>
    %c0_12 = arith.constant 0 : index
    %c0_13 = arith.constant 0 : index
    %21 = vector.load %arg5[%c0_12, %c0_13] : memref<8x1xf32, #tpu.memory_space<vmem>>, vector<8x1xf32>
    tpu.vector_store %arg5[%c0_12, %c0_13], %20 {strides = array<i32>} : memref<8x1xf32, #tpu.memory_space<vmem>>, vector<8x1xf32>,
    return
  }
}

</mosaic_0001>

<bundles_post_ra>
// kernel: tpu_custom_call.1
= control target key start
LH: loop header
LB: loop body
LE: loop exit
PB: predicated region body
PF: predicated region fallthrough
CT: control target
= control target key end

     0   :  { %s334_s0 = inlined_call_operand.hbm [shape: f32[8,32], index: 0, kind: input, shape index: {}]   ;;  %s335_s1 = inlined_call_operand.hbm [shape: f32[32,32], index: 1, kind: input, shape index: {}]   ;;  %s336_s2 = inlined_call_operand.vmem [shape: f32[1,32], index: 2, kind: input, shape index: {}]   ;;  %s337_s3 = inlined_call_operand.vmem [shape: f32[1,32], index: 3, kind: input, shape index: {}]   ;;  %s338_s4 = inlined_call_operand.<no memory space> [shape: f32[1,1], index: 4, kind: input, shape index: {}]   ;;  %s339_s5 = inlined_call_operand.vmem [shape: f32[8,1], index: 5, kind: output, shape index: {}]  }
   0x1   :  { %v10_v0 = vstv %s338_s4 }
   0x2   :  { %11 = vst [vmem:[#allocation2] sm:$0x1] %v10_v0 }
   0x3   :  { %12 = vsyncpa [#allocation4], 0 }
   0x4   :  { %13 = vsyncpa [#allocation6], 0  ;;  %s254_s20 = smov [#allocation3]   ;;  %s255_s22 = smov [#allocation5]  }
   0x5   :  { %s20_s21 = sshll.u32 %s254_s20, 4  ;;  %s29_s23 = sshll.u32 %s255_s22, 4  ;;  %s21_s21 = int_to_ptr.vmem [resolvable:$true] %s20_s21  ;;  %s294_s23 = int_to_ptr.vmem [resolvable:$true] %s29_s23 }
   0x6   :  { %s206_s26 = scalar_lea.hbm %s334_s0, 128 }
   0x7   :  { %p207_p0 = scmp.ne.s32.totalorder %s334_s0, %s206_s26  ;;  %p210_p1 = scmp.lt.u32.totalorder %s206_s26, %s334_s0 }
   0x9   :  { %p212_p2 = pnand %p210_p1, %p207_p0 }
   0xb   :  { %215 = shalt.err (!%p212_p2)
}
   0xc   :  { %s216_s30 = scalar_lea.vmem %s21_s21, 128  ;;  %p221_p4 = scmp.lt.s32.totalorder %s21_s21, %s21_s21 }
   0xd   :  { %p217_p3 = scmp.ne.s32.totalorder %s21_s21, %s216_s30  ;;  %p222_p5 = scmp.lt.s32.totalorder %s216_s30, %s216_s30 }
   0xf   :  { %p223_p6 = por %p222_p5, %p221_p4 }
  0x11   :  { %p224_p7 = pnand %p223_p6, %p217_p3 }
  0x13   :  { %227 = shalt.err (!%p224_p7)
}
  0x14   :  { %23 = dma.hbm_to_vmem [thread:$0]  %s334_s0, 128, %s21_s21, [#allocation4]  }
  0x15   :  { %s228_s10 = scalar_lea.hbm %s335_s1, 512 }
  0x16   :  { %p229_p8 = scmp.ne.s32.totalorder %s335_s1, %s228_s10  ;;  %p232_p9 = scmp.lt.u32.totalorder %s228_s10, %s335_s1 }
  0x18   :  { %p234_p10 = pnand %p232_p9, %p229_p8 }
  0x1a   :  { %237 = shalt.err (!%p234_p10)
}
  0x1b   :  { %s238_s15 = scalar_lea.vmem %s294_s23, 512  ;;  %p243_p12 = scmp.lt.s32.totalorder %s294_s23, %s294_s23 }
  0x1c   :  { %p239_p11 = scmp.ne.s32.totalorder %s294_s23, %s238_s15  ;;  %p244_p13 = scmp.lt.s32.totalorder %s238_s15, %s238_s15 }
  0x1e   :  { %p245_p0 = por %p244_p13, %p243_p12 }
  0x20   :  { %p246_p1 = pnand %p245_p0, %p239_p11 }
  0x22   :  { %249 = shalt.err (!%p246_p1)
}
  0x23   :  { %s256_s0 = smov 128   ;;  %s257_s16 = smov 8  }
  0x24   :  { %35 = dma.hbm_to_vmem [thread:$0]  %s335_s1, 512, %s294_s23, [#allocation6], %s256_s0, %s256_s0, %s257_s16  }
  0x25   :  { %250 = dma.done.wait [#allocation4], 128  }
  0x26   :  { %251 = vsyncadd [#allocation4], 4294967168 }
  0x27   :  { %252 = dma.done.wait [#allocation6], 512  }
  0x28   :  { %253 = vsyncadd [#allocation6], 4294966784  ;;  %v258_v1 = vmov 0.0|0.0   ;;  %vm259_vm0 = vmmov 0   ;;  %v260_v2 = vmov 0.0   ;;  %v49_v3 = vld [vmem:[#allocation5] sm:$0xff] }
  0x29   :  { %189 = vmatprep.subr.bf16.mxu0 %v258_v1  ;;  %186 = vmatprep.mubr.msk.f32.mxu0 %vm259_vm0, %v260_v2  ;;  %v50_v4 = vld [vmem:[#allocation5 + $0x8] sm:$0xff]  ;;  %v51_v5 = vld [vmem:[#allocation5 + $0x10] sm:$0xff]  ;;  %v52_v7 = vld [vmem:[#allocation5 + $0x18] sm:$0xff]  ;;  %vm60_vm1 = vcmask 261120   ;;  %vm160_vm2 = vcmask 7168  }
  0x2a   :  { %v190_v6 = vpack.c.bf16 %v50_v4, %v49_v3  ;;  %v193_v8 = vpack.c.bf16 %v52_v7, %v51_v5  ;;  %v48_v9 = vld [vmem:[#allocation3] sm:$0xff]  ;;  %v168_v10 = vld [vmem:[%s336_s2] ss:$0 sm:$0xff] }
  0x2b   :  { %v170_v14 = vld [vmem:[%s337_s3] ss:$0 sm:$0xff] }
  0x2c   :  { %191 = vmatpush3.bf16.msra.mxu0 %v190_v6  ;;  %v171_v18 = vld [vmem:[#allocation2] ss:$0 sm:$0xff] }
  0x2d   :  { %192 = vmatprep.subr.bf16.mxu0 %v258_v1 }
  0x30   :  { %194 = vmatpush3.bf16.msra.mxu0 %v193_v8 }
  0x33   :  { %187 = vmatmul.mubr.msk.f32.vlgmr.msra.gmra.mrb[0].mxu0 %vm60_vm1, %v48_v9 }
 0x106   :  { %v130_v11 = vpop.f32.mrb[0].mxu0 }
 0x107   :  { %v131_v12 = vadd.f32 %v168_v10, %v130_v11  ;;  %v188_v13 = vpop.f32.mrb[1].mxu0 }
 0x109   :  { %v134_v15 = vmax.f32 %v131_v12, 0.0 }
 0x10b   :  { %v142_v16 = vmul.f32 %v170_v14, %v134_v15 }
 0x10d   :  { %v143_v17 = vsel %vm60_vm1, %v142_v16, 0.0 }
 0x10e   :  { %144 = vadd.xlane.f32.xlu0 %v143_v17 }
 0x19b   :  { %v145_v19 = vpop.xlane.xlu0 %144 }
 0x19c   :  { %v153_v20 = vadd.f32 %v171_v18, %v145_v19 }
 0x19e   :  { %v172_v21 = vmul.f32 -1.442695, %v153_v20 }
 0x1a0   :  { %202 = vpow2.f32 %v172_v21 }
 0x1aa   :  { %v203_v22 = vpop.eup %202 }
 0x1ab   :  { %v157_v23 = vadd.f32 1.0, %v203_v22 }
 0x1ad   :  { %204 = vrcp.f32 %v157_v23 }
 0x1b7   :  { %v205_v24 = vpop.eup %204 }
 0x1b8   :  { %161 = vst.msk [vmem:[%s339_s5] sm:$0xff] %vm160_vm2, %v205_v24 }
 0x1b9   :  { %166 = vsyncpa [#allocation4], 1 }
 0x1ba   :  { %167 = vsyncpa [#allocation6], 1 }

</bundles_post_ra>
